<compile_context>
chip_gen: v7x
topology: tpu7x:2x2x1
jax: 0.10.0
libtpu: 0.0.40
codegen_flags: <defaults>
</compile_context>

<pallas_src>
import jax
import jax.numpy as jnp
from jax.experimental import pallas as pl
from jax.experimental.pallas import tpu as pltpu

MAX_TILE_ROWS = 1024   # rows per tile per stream (f32, lane dim = feature width)
SPLIT_3DMM = 52
KL_P = 0.0002


# ------------------------------ helpers -------------------------------------


def _round_up(x, m):
    return ((x + m - 1) // m) * m


def _cdiv(a, b):
    return -(-a // b)


def _in_index_map(nblk):
    """Input block index map; clamps so short streams re-read their last block
    (the compute for those steps is fully masked out in-kernel)."""
    if nblk == 1:
        return lambda s: (0, 0)
    last = nblk - 1
    return lambda s: (jnp.minimum(s, last), 0)


# ------------------------------ fused kernel --------------------------------


def _make_fused_kernel(metas, n_steps):
    """metas: list of (rows, tile_rows, n_blocks, op) with op in {'sqdiff','kl'}."""
    n = len(metas)

    def kernel(*refs):
        in_refs = refs[:2 * n]
        acc_refs = refs[2 * n:]
        step = pl.program_id(0)

        @pl.when(step == 0)
        def _():
            for acc in acc_refs:
                acc[...] = jnp.zeros_like(acc)

        for i, (rows, tr, nblk, op) in enumerate(metas):
            a = in_refs[2 * i][...].astype(jnp.float32)
            b = in_refs[2 * i + 1][...].astype(jnp.float32)
            if op == "sqdiff":
                d = a - b
                val = d * d
            else:  # 'kl': elementwise KL( N(a, b) || N(0, 1) );  log -> EUP slot
                val = 0.5 * (b * b + a * a) - jnp.log(b) - 0.5

            # Row-validity mask: ragged last tile and grid steps beyond this
            # stream's extent contribute exactly zero (jnp.where, NaN-safe).
            needs_mask = (rows % tr != 0) or (nblk < n_steps)
            if needs_mask:
                valid = rows - step * tr
                row_id = jax.lax.broadcasted_iota(jnp.int32, val.shape, 0)
                val = jnp.where(row_id < valid, val, 0.0)

            acc_refs[i][...] += val   # full-block VPU accumulate, no XLU reduce

    return kernel


def _fused_partial_sums(streams):
    """One pallas_call streaming every (a, b, op) pair tile-by-tile.

    Returns one per-lane f32 accumulator per stream, shape (tile_rows, D);
    the caller reduces/normalizes these tiny arrays.
    """
    metas, in_specs, out_specs, out_shapes, args = [], [], [], [], []
    for a, b, op in streams:
        a2 = a.reshape(-1, a.shape[-1])     # metadata-only for contiguous inputs
        b2 = b.reshape(-1, b.shape[-1])
        rows, d = a2.shape
        tr = min(MAX_TILE_ROWS, _round_up(rows, 8))
        nblk = _cdiv(rows, tr)
        metas.append((rows, tr, nblk, op))
        spec = pl.BlockSpec((tr, d), _in_index_map(nblk))
        in_specs.extend([spec, spec])
        out_specs.append(pl.BlockSpec((tr, d), lambda s: (0, 0)))   # resident acc
        out_shapes.append(jax.ShapeDtypeStruct((tr, d), jnp.float32))
        args.extend([a2, b2])

    n_steps = max(m[2] for m in metas)

    return pl.pallas_call(
        _make_fused_kernel(metas, n_steps),
        out_shape=tuple(out_shapes),
        grid_spec=pltpu.PrefetchScalarGridSpec(
            num_scalar_prefetch=0,
            grid=(n_steps,),
            in_specs=in_specs,
            out_specs=tuple(out_specs)),
        compiler_params=pltpu.CompilerParams(
            dimension_semantics=("arbitrary",),
            vmem_limit_bytes=32 * 1024 * 1024),
    )(*args)


# ------------------------------- VAELoss ------------------------------------


def vae_loss(gt_emotion, gt_3dmm, pred_emotion, pred_3dmm,
             dist_mu, dist_scale, kl_p=KL_P,
             listener_reaction_pred=None, list_pos=None):
    """Pallas VAELoss forward (contrastive=None path).

    dist_mu / dist_scale are the Normal parameters of the `distribution` list,
    stacked along a leading axis of length T (distribution[t].loc / .scale).
    Returns (loss, rec_loss, kld_loss, rec_latent) as f32 scalars.
    """
    streams = [
        (pred_emotion, gt_emotion, "sqdiff"),
        (pred_3dmm, gt_3dmm, "sqdiff"),
        (dist_mu, dist_scale, "kl"),
    ]
    if listener_reaction_pred is not None:
        streams.append((listener_reaction_pred, list_pos, "sqdiff"))

    outs = _fused_partial_sums(streams)
    acc_emo, acc_3dmm, acc_kl = outs[0], outs[1], outs[2]

    # Means use the TRUE element counts (tiling / masking never changes them).
    mse_emotion = jnp.sum(acc_emo) / gt_emotion.size

    d3 = gt_3dmm.shape[-1]
    lead3 = gt_3dmm.size // d3
    mse_3dmm_lo = jnp.sum(acc_3dmm[:, :SPLIT_3DMM]) / (lead3 * SPLIT_3DMM)
    mse_3dmm_hi = jnp.sum(acc_3dmm[:, SPLIT_3DMM:]) / (lead3 * (d3 - SPLIT_3DMM))

    rec_loss = mse_emotion + mse_3dmm_lo + 10.0 * mse_3dmm_hi
    kld_loss = jnp.sum(acc_kl) / dist_mu.size
    loss = rec_loss + kl_p * kld_loss

    rec_latent = jnp.float32(0.0)
    if listener_reaction_pred is not None:
        rec_latent = jnp.sum(outs[3]) / listener_reaction_pred.size
        loss = loss + rec_latent

    # TODO(synk): the `contrastive` branch invokes an externally supplied nn.Module
    # (not part of this spec); only the contrastive=None path is implemented.
    return loss, rec_loss, kld_loss, rec_latent


# ------------------------------- reference ----------------------------------


def _reference(gt_emotion, gt_3dmm, pred_emotion, pred_3dmm, mu, scale, kl_p=KL_P):
    mse = lambda a, b: jnp.mean((a.astype(jnp.float32) - b.astype(jnp.float32)) ** 2)
    rec = (mse(pred_emotion, gt_emotion)
           + mse(pred_3dmm[..., :SPLIT_3DMM], gt_3dmm[..., :SPLIT_3DMM])
           + 10.0 * mse(pred_3dmm[..., SPLIT_3DMM:], gt_3dmm[..., SPLIT_3DMM:]))
    m = mu.astype(jnp.float32)
    s = scale.astype(jnp.float32)
    kl = 0.5 * (s * s + m * m) - jnp.log(s) - 0.5
    kld = jnp.mean(kl)
    return rec + kl_p * kld, rec, kld, jnp.float32(0.0)


if __name__ == "__main__":
    key = jax.random.PRNGKey(0)
    k = jax.random.split(key, 8)

    B, S = 2, 8            # batch, sequence
    D_EMO = 25             # emotion features
    D_3DMM = 58            # 52 expression coeffs + 6 pose coeffs
    T, D_Z = 8, 32         # distribution list length, latent dim

    gt_emotion = jax.random.normal(k[0], (B, S, D_EMO), jnp.float32)
    pred_emotion = jax.random.normal(k[1], (B, S, D_EMO), jnp.float32)
    gt_3dmm = jax.random.normal(k[2], (B, S, D_3DMM), jnp.float32)
    pred_3dmm = jax.random.normal(k[3], (B, S, D_3DMM), jnp.float32)
    dist_mu = jax.random.normal(k[4], (T, B, D_Z), jnp.float32)
    dist_scale = jax.nn.softplus(
        jax.random.normal(k[5], (T, B, D_Z), jnp.float32)) + 0.1

    # --- default path (contrastive=None, no listener term) ---
    loss, rec_loss, kld_loss, rec_latent = vae_loss(
        gt_emotion, gt_3dmm, pred_emotion, pred_3dmm, dist_mu, dist_scale)
    loss = jax.block_until_ready(loss)

    ref_loss, ref_rec, ref_kld, _ = _reference(
        gt_emotion, gt_3dmm, pred_emotion, pred_3dmm, dist_mu, dist_scale)

    assert jnp.allclose(loss, ref_loss, rtol=1e-5, atol=1e-5), (loss, ref_loss)
    assert jnp.allclose(rec_loss, ref_rec, rtol=1e-5, atol=1e-5), (rec_loss, ref_rec)
    assert jnp.allclose(kld_loss, ref_kld, rtol=1e-5, atol=1e-5), (kld_loss, ref_kld)
    assert jnp.allclose(rec_latent, 0.0), rec_latent

    # --- listener-reaction latent reconstruction path (4th fused stream) ---
    listener_pred = jax.random.normal(k[6], (B, S, D_Z), jnp.float32)
    list_pos = jax.random.normal(k[7], (B, S, D_Z), jnp.float32)
    loss2, rec2, kld2, lat2 = vae_loss(
        gt_emotion, gt_3dmm, pred_emotion, pred_3dmm, dist_mu, dist_scale,
        listener_reaction_pred=listener_pred, list_pos=list_pos)
    loss2 = jax.block_until_ready(loss2)

    ref_lat = jnp.mean((listener_pred - list_pos) ** 2)
    assert jnp.allclose(lat2, ref_lat, rtol=1e-5, atol=1e-5), (lat2, ref_lat)
    assert jnp.allclose(loss2, ref_loss + ref_lat, rtol=1e-5, atol=1e-5), (
        loss2, ref_loss + ref_lat)
    assert jnp.allclose(rec2, ref_rec, rtol=1e-5, atol=1e-5)
    assert jnp.allclose(kld2, ref_kld, rtol=1e-5, atol=1e-5)

    print("KERNEL_OK")
</pallas_src>

<mosaic_0001>
module attributes {stable_mosaic.version = 11 : i64} {
  func.func @kernel(%arg0: i32, %arg1: memref<16x25xf32, #tpu.memory_space<vmem>>, %arg2: memref<16x25xf32, #tpu.memory_space<vmem>>, %arg3: memref<16x58xf32, #tpu.memory_space<vmem>>, %arg4: memref<16x58xf32, #tpu.memory_space<vmem>>, %arg5: memref<16x32xf32, #tpu.memory_space<vmem>>, %arg6: memref<16x32xf32, #tpu.memory_space<vmem>>, %arg7: memref<16x25xf32, #tpu.memory_space<vmem>>, %arg8: memref<16x58xf32, #tpu.memory_space<vmem>>, %arg9: memref<16x32xf32, #tpu.memory_space<vmem>>) attributes {dimension_semantics = [#tpu.dimension_semantics<arbitrary>], iteration_bounds = array<i64: 1>, scalar_prefetch = 0 : i64, scratch_operands = 0 : i64, tpu.core_type = #tpu.core_type<tc>, window_params = [{pipeline_mode = #tpu.pipeline_mode<synchronous>, transform_indices = @transform_0, window_bounds = array<i64: 16, 25>}, {pipeline_mode = #tpu.pipeline_mode<synchronous>, transform_indices = @transform_1, window_bounds = array<i64: 16, 25>}, {pipeline_mode = #tpu.pipeline_mode<synchronous>, transform_indices = @transform_2, window_bounds = array<i64: 16, 58>}, {pipeline_mode = #tpu.pipeline_mode<synchronous>, transform_indices = @transform_3, window_bounds = array<i64: 16, 58>}, {pipeline_mode = #tpu.pipeline_mode<synchronous>, transform_indices = @transform_4, window_bounds = array<i64: 16, 32>}, {pipeline_mode = #tpu.pipeline_mode<synchronous>, transform_indices = @transform_5, window_bounds = array<i64: 16, 32>}, {pipeline_mode = #tpu.pipeline_mode<synchronous>, transform_indices = @transform_6, window_bounds = array<i64: 16, 25>}, {pipeline_mode = #tpu.pipeline_mode<synchronous>, transform_indices = @transform_7, window_bounds = array<i64: 16, 58>}, {pipeline_mode = #tpu.pipeline_mode<synchronous>, transform_indices = @transform_8, window_bounds = array<i64: 16, 32>}]} {
    %c0_i32 = arith.constant 0 : i32
    %0 = arith.cmpi eq, %arg0, %c0_i32 : i32
    %1 = arith.extui %0 : i1 to i32
    %c0_i32_0 = arith.constant 0 : i32
    %2 = arith.cmpi ne, %1, %c0_i32_0 : i32
    scf.if %2 {
      %cst_25 = arith.constant 0.000000e+00 : f32
      %31 = vector.broadcast %cst_25 : f32 to vector<16x25xf32>
      %c0_26 = arith.constant 0 : index
      %c0_27 = arith.constant 0 : index
      %32 = vector.load %arg7[%c0_26, %c0_27] : memref<16x25xf32, #tpu.memory_space<vmem>>, vector<16x25xf32>
      tpu.vector_store %arg7[%c0_26, %c0_27], %31 {strides = array<i32>} : memref<16x25xf32, #tpu.memory_space<vmem>>, vector<16x25xf32>,
      %cst_28 = arith.constant 0.000000e+00 : f32
      %33 = vector.broadcast %cst_28 : f32 to vector<16x58xf32>
      %c0_29 = arith.constant 0 : index
      %c0_30 = arith.constant 0 : index
      %34 = vector.load %arg8[%c0_29, %c0_30] : memref<16x58xf32, #tpu.memory_space<vmem>>, vector<16x58xf32>
      tpu.vector_store %arg8[%c0_29, %c0_30], %33 {strides = array<i32>} : memref<16x58xf32, #tpu.memory_space<vmem>>, vector<16x58xf32>,
      %cst_31 = arith.constant 0.000000e+00 : f32
      %35 = vector.broadcast %cst_31 : f32 to vector<16x32xf32>
      %c0_32 = arith.constant 0 : index
      %c0_33 = arith.constant 0 : index
      %36 = vector.load %arg9[%c0_32, %c0_33] : memref<16x32xf32, #tpu.memory_space<vmem>>, vector<16x32xf32>
      tpu.vector_store %arg9[%c0_32, %c0_33], %35 {strides = array<i32>} : memref<16x32xf32, #tpu.memory_space<vmem>>, vector<16x32xf32>,
    } else {
    }
    %c0 = arith.constant 0 : index
    %c0_1 = arith.constant 0 : index
    %3 = vector.load %arg1[%c0, %c0_1] : memref<16x25xf32, #tpu.memory_space<vmem>>, vector<16x25xf32>
    %c0_2 = arith.constant 0 : index
    %c0_3 = arith.constant 0 : index
    %4 = vector.load %arg2[%c0_2, %c0_3] : memref<16x25xf32, #tpu.memory_space<vmem>>, vector<16x25xf32>
    %5 = arith.subf %3, %4 : vector<16x25xf32>
    %6 = arith.mulf %5, %5 : vector<16x25xf32>
    %c0_4 = arith.constant 0 : index
    %c0_5 = arith.constant 0 : index
    %7 = vector.load %arg7[%c0_4, %c0_5] : memref<16x25xf32, #tpu.memory_space<vmem>>, vector<16x25xf32>
    %8 = arith.addf %7, %6 : vector<16x25xf32>
    %c0_6 = arith.constant 0 : index
    %c0_7 = arith.constant 0 : index
    %9 = vector.load %arg7[%c0_6, %c0_7] : memref<16x25xf32, #tpu.memory_space<vmem>>, vector<16x25xf32>
    tpu.vector_store %arg7[%c0_6, %c0_7], %8 {strides = array<i32>} : memref<16x25xf32, #tpu.memory_space<vmem>>, vector<16x25xf32>,
    %c0_8 = arith.constant 0 : index
    %c0_9 = arith.constant 0 : index
    %10 = vector.load %arg3[%c0_8, %c0_9] : memref<16x58xf32, #tpu.memory_space<vmem>>, vector<16x58xf32>
    %c0_10 = arith.constant 0 : index
    %c0_11 = arith.constant 0 : index
    %11 = vector.load %arg4[%c0_10, %c0_11] : memref<16x58xf32, #tpu.memory_space<vmem>>, vector<16x58xf32>
    %12 = arith.subf %10, %11 : vector<16x58xf32>
    %13 = arith.mulf %12, %12 : vector<16x58xf32>
    %c0_12 = arith.constant 0 : index
    %c0_13 = arith.constant 0 : index
    %14 = vector.load %arg8[%c0_12, %c0_13] : memref<16x58xf32, #tpu.memory_space<vmem>>, vector<16x58xf32>
    %15 = arith.addf %14, %13 : vector<16x58xf32>
    %c0_14 = arith.constant 0 : index
    %c0_15 = arith.constant 0 : index
    %16 = vector.load %arg8[%c0_14, %c0_15] : memref<16x58xf32, #tpu.memory_space<vmem>>, vector<16x58xf32>
    tpu.vector_store %arg8[%c0_14, %c0_15], %15 {strides = array<i32>} : memref<16x58xf32, #tpu.memory_space<vmem>>, vector<16x58xf32>,
    %c0_16 = arith.constant 0 : index
    %c0_17 = arith.constant 0 : index
    %17 = vector.load %arg5[%c0_16, %c0_17] : memref<16x32xf32, #tpu.memory_space<vmem>>, vector<16x32xf32>
    %c0_18 = arith.constant 0 : index
    %c0_19 = arith.constant 0 : index
    %18 = vector.load %arg6[%c0_18, %c0_19] : memref<16x32xf32, #tpu.memory_space<vmem>>, vector<16x32xf32>
    %19 = arith.mulf %18, %18 : vector<16x32xf32>
    %20 = arith.mulf %17, %17 : vector<16x32xf32>
    %21 = arith.addf %19, %20 : vector<16x32xf32>
    %cst = arith.constant 5.000000e-01 : f32
    %22 = vector.broadcast %cst : f32 to vector<16x32xf32>
    %23 = arith.mulf %22, %21 : vector<16x32xf32>
    %24 = math.log %18 : vector<16x32xf32>
    %25 = arith.subf %23, %24 : vector<16x32xf32>
    %cst_20 = arith.constant 5.000000e-01 : f32
    %26 = vector.broadcast %cst_20 : f32 to vector<16x32xf32>
    %27 = arith.subf %25, %26 : vector<16x32xf32>
    %c0_21 = arith.constant 0 : index
    %c0_22 = arith.constant 0 : index
    %28 = vector.load %arg9[%c0_21, %c0_22] : memref<16x32xf32, #tpu.memory_space<vmem>>, vector<16x32xf32>
    %29 = arith.addf %28, %27 : vector<16x32xf32>
    %c0_23 = arith.constant 0 : index
    %c0_24 = arith.constant 0 : index
    %30 = vector.load %arg9[%c0_23, %c0_24] : memref<16x32xf32, #tpu.memory_space<vmem>>, vector<16x32xf32>
    tpu.vector_store %arg9[%c0_23, %c0_24], %29 {strides = array<i32>} : memref<16x32xf32, #tpu.memory_space<vmem>>, vector<16x32xf32>,
    return
  }
  func.func @transform_0(%arg0: i32) -> (i32, i32) {
    %c0_i32 = arith.constant 0 : i32
    %c0_i32_0 = arith.constant 0 : i32
    %c0_i32_1 = arith.constant 0 : i32
    return %c0_i32, %c0_i32_0 : i32, i32
  }
  func.func @transform_1(%arg0: i32) -> (i32, i32) {
    %c0_i32 = arith.constant 0 : i32
    %c0_i32_0 = arith.constant 0 : i32
    %c0_i32_1 = arith.constant 0 : i32
    return %c0_i32, %c0_i32_0 : i32, i32
  }
  func.func @transform_2(%arg0: i32) -> (i32, i32) {
    %c0_i32 = arith.constant 0 : i32
    %c0_i32_0 = arith.constant 0 : i32
    %c0_i32_1 = arith.constant 0 : i32
    return %c0_i32, %c0_i32_0 : i32, i32
  }
  func.func @transform_3(%arg0: i32) -> (i32, i32) {
    %c0_i32 = arith.constant 0 : i32
    %c0_i32_0 = arith.constant 0 : i32
    %c0_i32_1 = arith.constant 0 : i32
    return %c0_i32, %c0_i32_0 : i32, i32
  }
  func.func @transform_4(%arg0: i32) -> (i32, i32) {
    %c0_i32 = arith.constant 0 : i32
    %c0_i32_0 = arith.constant 0 : i32
    %c0_i32_1 = arith.constant 0 : i32
    return %c0_i32, %c0_i32_0 : i32, i32
  }
  func.func @transform_5(%arg0: i32) -> (i32, i32) {
    %c0_i32 = arith.constant 0 : i32
    %c0_i32_0 = arith.constant 0 : i32
    %c0_i32_1 = arith.constant 0 : i32
    return %c0_i32, %c0_i32_0 : i32, i32
  }
  func.func @transform_6(%arg0: i32) -> (i32, i32) {
    %c0_i32 = arith.constant 0 : i32
    %c0_i32_0 = arith.constant 0 : i32
    %c0_i32_1 = arith.constant 0 : i32
    return %c0_i32, %c0_i32_0 : i32, i32
  }
  func.func @transform_7(%arg0: i32) -> (i32, i32) {
    %c0_i32 = arith.constant 0 : i32
    %c0_i32_0 = arith.constant 0 : i32
    %c0_i32_1 = arith.constant 0 : i32
    return %c0_i32, %c0_i32_0 : i32, i32
  }
  func.func @transform_8(%arg0: i32) -> (i32, i32) {
    %c0_i32 = arith.constant 0 : i32
    %c0_i32_0 = arith.constant 0 : i32
    %c0_i32_1 = arith.constant 0 : i32
    return %c0_i32, %c0_i32_0 : i32, i32
  }
}

</mosaic_0001>

<bundles_post_ra>
// kernel: tpu_custom_call.1
= control target key start
LH: loop header
LB: loop body
LE: loop exit
PB: predicated region body
PF: predicated region fallthrough
CT: control target
= control target key end

     0   :  { %14 = vsyncpa [#allocation3], 0  ;;  %s634_s0 = inlined_call_operand.hbm [shape: f32[16,25], index: 0, kind: input, shape index: {}]   ;;  %s635_s1 = inlined_call_operand.hbm [shape: f32[16,25], index: 1, kind: input, shape index: {}]   ;;  %s636_s2 = inlined_call_operand.hbm [shape: f32[16,58], index: 2, kind: input, shape index: {}]   ;;  %s637_s3 = inlined_call_operand.hbm [shape: f32[16,58], index: 3, kind: input, shape index: {}]   ;;  %s638_s4 = inlined_call_operand.hbm [shape: f32[16,32], index: 4, kind: input, shape index: {}]   ;;  %s639_s5 = inlined_call_operand.vmem [shape: f32[16,32], index: 5, kind: input, shape index: {}]   ;;  %s640_s6 = inlined_call_operand.hbm [shape: f32[16,25], index: 6, kind: output, shape index: {0}]   ;;  %s641_s7 = inlined_call_operand.hbm [shape: f32[16,58], index: 7, kind: output, shape index: {1}]   ;;  %s642_s8 = inlined_call_operand.hbm [shape: f32[16,32], index: 8, kind: output, shape index: {2}]  }
   0x1   :  { %15 = vsyncpa [#allocation6], 0 }
   0x2   :  { %16 = vsyncpa [#allocation9], 0 }
   0x3   :  { %17 = vsyncpa [#allocation4], 0 }
   0x4   :  { %18 = vsyncpa [#allocation13], 0  ;;  %s419_s27 = smov [#allocation5]   ;;  %s420_s29 = smov [#allocation8]  }
   0x5   :  { %s36_s28 = sshll.u32 %s419_s27, 4  ;;  %s60_s30 = sshll.u32 %s420_s29, 4  ;;  %s37_s28 = int_to_ptr.vmem [resolvable:$true] %s36_s28  ;;  %s475_s30 = int_to_ptr.vmem [resolvable:$true] %s60_s30 }
   0x6   :  { %s233_s11 = scalar_lea.hbm %s635_s1, 256 }
   0x7   :  { %p234_p0 = scmp.ne.s32.totalorder %s635_s1, %s233_s11  ;;  %p237_p1 = scmp.lt.u32.totalorder %s233_s11, %s635_s1 }
   0x9   :  { %p239_p2 = pnand %p237_p1, %p234_p0 }
   0xb   :  { %242 = shalt.err (!%p239_p2)
}
   0xc   :  { %s243_s16 = scalar_lea.vmem %s37_s28, 256  ;;  %p248_p4 = scmp.lt.s32.totalorder %s37_s28, %s37_s28 }
   0xd   :  { %p244_p3 = scmp.ne.s32.totalorder %s37_s28, %s243_s16  ;;  %p249_p5 = scmp.lt.s32.totalorder %s243_s16, %s243_s16 }
   0xf   :  { %p250_p6 = por %p249_p5, %p248_p4 }
  0x11   :  { %p251_p7 = pnand %p250_p6, %p244_p3 }
  0x13   :  { %254 = shalt.err (!%p251_p7)
}
  0x14   :  { %s421_s17 = smov 128   ;;  %s422_s18 = smov 8  }
  0x15   :  { %42 = dma.hbm_to_vmem [thread:$0]  %s635_s1, 256, %s37_s28, [#allocation6], %s421_s17, %s421_s17, %s422_s18  }
  0x16   :  { %s255_s23 = scalar_lea.hbm %s637_s3, 256 }
  0x17   :  { %p256_p8 = scmp.ne.s32.totalorder %s637_s3, %s255_s23  ;;  %p259_p9 = scmp.lt.u32.totalorder %s255_s23, %s637_s3 }
  0x19   :  { %p261_p10 = pnand %p259_p9, %p256_p8 }
  0x1b   :  { %264 = shalt.err (!%p261_p10)
}
  0x1c   :  { %s265_s29 = scalar_lea.vmem %s475_s30, 256  ;;  %p270_p12 = scmp.lt.s32.totalorder %s475_s30, %s475_s30 }
  0x1d   :  { %p266_p11 = scmp.ne.s32.totalorder %s475_s30, %s265_s29  ;;  %p271_p13 = scmp.lt.s32.totalorder %s265_s29, %s265_s29 }
  0x1f   :  { %p272_p0 = por %p271_p13, %p270_p12 }
  0x21   :  { %p273_p1 = pnand %p272_p0, %p266_p11 }
  0x23   :  { %276 = shalt.err (!%p273_p1)
}
  0x24   :  { %66 = dma.hbm_to_vmem [thread:$0]  %s637_s3, 256, %s475_s30, [#allocation9], %s421_s17, %s421_s17, %s422_s18  }
  0x25   :  { %s423_s9 = smov [#allocation2]   ;;  %s424_s11 = smov [#allocation7]  }
  0x26   :  { %s24_s10 = sshll.u32 %s423_s9, 4  ;;  %s48_s12 = sshll.u32 %s424_s11, 4  ;;  %s25_s10 = int_to_ptr.vmem [resolvable:$true] %s24_s10  ;;  %s512_s12 = int_to_ptr.vmem [resolvable:$true] %s48_s12 }
  0x27   :  { %s277_s15 = scalar_lea.hbm %s634_s0, 256 }
  0x28   :  { %p278_p2 = scmp.ne.s32.totalorder %s634_s0, %s277_s15  ;;  %p281_p3 = scmp.lt.u32.totalorder %s277_s15, %s634_s0 }
  0x2a   :  { %p283_p4 = pnand %p281_p3, %p278_p2 }
  0x2c   :  { %286 = shalt.err (!%p283_p4)
}
  0x2d   :  { %s287_s3 = scalar_lea.vmem %s25_s10, 256  ;;  %p292_p6 = scmp.lt.s32.totalorder %s25_s10, %s25_s10 }
  0x2e   :  { %p288_p5 = scmp.ne.s32.totalorder %s25_s10, %s287_s3  ;;  %p293_p7 = scmp.lt.s32.totalorder %s287_s3, %s287_s3 }
  0x30   :  { %p294_p8 = por %p293_p7, %p292_p6 }
  0x32   :  { %p295_p9 = pnand %p294_p8, %p288_p5 }
  0x34   :  { %298 = shalt.err (!%p295_p9)
}
  0x35   :  { %30 = dma.hbm_to_vmem [thread:$0]  %s634_s0, 256, %s25_s10, [#allocation3], %s421_s17, %s421_s17, %s422_s18  }
  0x36   :  { %s299_s25 = scalar_lea.hbm %s636_s2, 256 }
  0x37   :  { %p300_p10 = scmp.ne.s32.totalorder %s636_s2, %s299_s25  ;;  %p303_p11 = scmp.lt.u32.totalorder %s299_s25, %s636_s2 }
  0x39   :  { %p305_p12 = pnand %p303_p11, %p300_p10 }
  0x3b   :  { %308 = shalt.err (!%p305_p12)
}
  0x3c   :  { %s309_s28 = scalar_lea.vmem %s512_s12, 256  ;;  %p314_p0 = scmp.lt.s32.totalorder %s512_s12, %s512_s12 }
  0x3d   :  { %p310_p13 = scmp.ne.s32.totalorder %s512_s12, %s309_s28  ;;  %p315_p1 = scmp.lt.s32.totalorder %s309_s28, %s309_s28 }
  0x3f   :  { %p316_p2 = por %p315_p1, %p314_p0 }
  0x41   :  { %p317_p3 = pnand %p316_p2, %p310_p13 }
  0x43   :  { %320 = shalt.err (!%p317_p3)
}
  0x44   :  { %54 = dma.hbm_to_vmem [thread:$0]  %s636_s2, 256, %s512_s12, [#allocation6], %s421_s17, %s421_s17, %s422_s18  }
  0x45   :  { %s425_s10 = smov [#allocation10]   ;;  %s321_s15 = scalar_lea.hbm %s638_s4, 256 }
  0x46   :  { %s72_s11 = sshll.u32 %s425_s10, 4  ;;  %p322_p4 = scmp.ne.s32.totalorder %s638_s4, %s321_s15  ;;  %s73_s11 = int_to_ptr.vmem [resolvable:$true] %s72_s11 }
  0x47   :  { %p325_p5 = scmp.lt.u32.totalorder %s321_s15, %s638_s4 }
  0x49   :  { %p327_p6 = pnand %p325_p5, %p322_p4 }
  0x4b   :  { %330 = shalt.err (!%p327_p6)
}
  0x4c   :  { %s331_s3 = scalar_lea.vmem %s73_s11, 256  ;;  %p336_p8 = scmp.lt.s32.totalorder %s73_s11, %s73_s11 }
  0x4d   :  { %p332_p7 = scmp.ne.s32.totalorder %s73_s11, %s331_s3  ;;  %p337_p9 = scmp.lt.s32.totalorder %s331_s3, %s331_s3 }
  0x4f   :  { %p338_p10 = por %p337_p9, %p336_p8 }
  0x51   :  { %p339_p11 = pnand %p338_p10, %p332_p7 }
  0x53   :  { %342 = shalt.err (!%p339_p11)
}
  0x54   :  { %78 = dma.hbm_to_vmem [thread:$0]  %s638_s4, 256, %s73_s11, [#allocation9], %s421_s17, %s421_s17, %s422_s18  }
  0x55   :  { %409 = dma.done.wait [#allocation3], 256  }
  0x56   :  { %410 = vsyncadd [#allocation3], 4294967040 }
  0x57   :  { %411 = dma.done.wait [#allocation6], 512  }
  0x58   :  { %412 = vsyncadd [#allocation6], 4294966784 }
  0x59   :  { %413 = dma.done.wait [#allocation9], 512  }
  0x5a   :  { %414 = vsyncadd [#allocation9], 4294966784  ;;  %vm103_vm0 = vcmask 474112   ;;  %vm100_vm1 = vcmask 203776   ;;  %vm106_vm2 = vcmask 261120   ;;  %v426_v0 = vmov 0.0  }
  0x5b   :  { %104 = vst.msk [vmem:[#allocation12] sm:$0xff] %vm103_vm0, %v426_v0  ;;  %105 = vst.msk [vmem:[#allocation12 + $0x8] sm:$0xff] %vm103_vm0, %v426_v0  ;;  %v124_v1 = vld [vmem:[#allocation7] sm:$0xff]  ;;  %v126_v2 = vld [vmem:[#allocation8] sm:$0xff]  ;;  %s427_s4 = smov [#allocation12]   ;;  %s428_s26 = smov [#allocation11]  }
  0x5c   :  { %101 = vst.msk [vmem:[#allocation11] sm:$0xff] %vm100_vm1, %v426_v0  ;;  %102 = vst.msk [vmem:[#allocation11 + $0x8] sm:$0xff] %vm100_vm1, %v426_v0  ;;  %v125_v3 = vld [vmem:[#allocation7 + $0x8] sm:$0xff]  ;;  %v128_v4 = vsub.f32 %v124_v1, %v126_v2  ;;  %v127_v5 = vld [vmem:[#allocation8 + $0x8] sm:$0xff]  ;;  %s183_s30 = sshll.u32 %s427_s4, 4  ;;  %s171_s27 = sshll.u32 %s428_s26, 4  ;;  %s184_s30 = int_to_ptr.vmem [resolvable:$true] %s183_s30  ;;  %s578_s27 = int_to_ptr.vmem [resolvable:$true] %s171_s27 }
  0x5d   :  { %107 = vst.msk [vmem:[#allocation14] sm:$0xff] %vm106_vm2, %v426_v0  ;;  %108 = vst.msk [vmem:[#allocation14 + $0x8] sm:$0xff] %vm106_vm2, %v426_v0  ;;  %v129_v7 = vsub.f32 %v125_v3, %v127_v5  ;;  %v109_v8 = vld [vmem:[#allocation2] sm:$0xff]  ;;  %v111_v9 = vld [vmem:[#allocation5] sm:$0xff]  ;;  %p348_p13 = scmp.lt.s32.totalorder %s184_s30, %s184_s30 }
  0x5e   :  { %v130_v10 = vmul.f32 %v128_v4, %v128_v4  ;;  %v113_v12 = vsub.f32 %v109_v8, %v111_v9  ;;  %v110_v13 = vld [vmem:[#allocation2 + $0x8] sm:$0xff]  ;;  %v112_v14 = vld [vmem:[#allocation5 + $0x8] sm:$0xff]  ;;  %v139_v18 = vld [vmem:[#allocation10] sm:$0xff] }
  0x5f   :  { %v131_v15 = vmul.f32 %v129_v7, %v129_v7  ;;  %v114_v17 = vsub.f32 %v110_v13, %v112_v14  ;;  %v141_v19 = vld [vmem:[%s639_s5] sm:$0xff]  ;;  %v140_v23 = vld [vmem:[#allocation10 + $0x8] sm:$0xff]  ;;  %v145_v29 = vmul.f32 %v139_v18, %v139_v18 }
  0x60   :  { %v115_v21 = vmul.f32 %v113_v12, %v113_v12  ;;  %v142_v24 = vld [vmem:[%s639_s5 + $0x8] sm:$0xff]  ;;  %229 = vlog2.f32 %v141_v19  ;;  %v143_v28 = vmul.f32 %v141_v19, %v141_v19  ;;  %v146_v32 = vmul.f32 %v140_v23, %v140_v23  ;;  %s343_s5 = scalar_lea.vmem %s184_s30, 256 }
  0x61   :  { %v116_v26 = vmul.f32 %v114_v17, %v114_v17  ;;  %231 = vlog2.f32 %v142_v24  ;;  %v144_v31 = vmul.f32 %v142_v24, %v142_v24  ;;  %p344_p12 = scmp.ne.s32.totalorder %s184_s30, %s343_s5  ;;  %p349_p0 = scmp.lt.s32.totalorder %s343_s5, %s343_s5 }
  0x62   :  { %v132_v6 = vld [vmem:[#allocation12] sm:$0xff]  ;;  %v133_v11 = vld [vmem:[#allocation12 + $0x8] sm:$0xff] }
  0x63   :  { %v117_v16 = vld [vmem:[#allocation11] sm:$0xff]  ;;  %v134_v20 = vadd.f32 %v132_v6, %v130_v10  ;;  %v118_v22 = vld [vmem:[#allocation11 + $0x8] sm:$0xff]  ;;  %v135_v25 = vadd.f32 %v133_v11, %v131_v15  ;;  %p350_p1 = por %p349_p0, %p348_p13 }
  0x64   :  { %v119_v27 = vadd.f32 %v117_v16, %v115_v21  ;;  %v120_v30 = vadd.f32 %v118_v22, %v116_v26 }
  0x65   :  { %137 = vst.msk [vmem:[#allocation12] sm:$0xff] %vm103_vm0, %v134_v20  ;;  %138 = vst.msk [vmem:[#allocation12 + $0x8] sm:$0xff] %vm103_vm0, %v135_v25  ;;  %p351_p2 = pnand %p350_p1, %p344_p12 }
  0x66   :  { %122 = vst.msk [vmem:[#allocation11] sm:$0xff] %vm100_vm1, %v119_v27 }
  0x67   :  { %354 = shalt.err (!%p351_p2)
}
  0x68   :  { %s355_s28 = scalar_lea.hbm %s641_s7, 256 }
  0x69   :  { %p356_p3 = scmp.ne.s32.totalorder %s641_s7, %s355_s28  ;;  %p359_p4 = scmp.lt.u32.totalorder %s355_s28, %s641_s7 }
  0x6b   :  { %p361_p5 = pnand %p359_p4, %p356_p3 }
  0x6d   :  { %364 = shalt.err (!%p361_p5)
}
  0x6e   :  { %189 = dma.vmem_to_hbm [thread:$0]  %s184_s30, 256, %s641_s7, [#allocation13], %s421_s17, %s421_s17, %s422_s18   ;;  %123 = vst.msk [vmem:[#allocation11 + $0x8] sm:$0xff] %vm100_vm1, %v120_v30  ;;  %v147_v33 = vadd.f32 %v145_v29, %v143_v28 }
  0x6f   :  { %s365_s15 = scalar_lea.vmem %s578_s27, 256  ;;  %p370_p7 = scmp.lt.s32.totalorder %s578_s27, %s578_s27 }
  0x70   :  { %p366_p6 = scmp.ne.s32.totalorder %s578_s27, %s365_s15  ;;  %p371_p8 = scmp.lt.s32.totalorder %s365_s15, %s365_s15 }
  0x72   :  { %p372_p9 = por %p371_p8, %p370_p7 }
  0x74   :  { %p373_p10 = pnand %p372_p9, %p366_p6 }
  0x76   :  { %376 = shalt.err (!%p373_p10)
}
  0x77   :  { %s377_s20 = scalar_lea.hbm %s640_s6, 256 }
  0x78   :  { %p378_p11 = scmp.ne.s32.totalorder %s640_s6, %s377_s20  ;;  %p381_p12 = scmp.lt.u32.totalorder %s377_s20, %s640_s6 }
  0x7a   :  { %p383_p13 = pnand %p381_p12, %p378_p11 }
  0x7c   :  { %386 = shalt.err (!%p383_p13)
}
  0x7d   :  { %177 = dma.vmem_to_hbm [thread:$0]  %s578_s27, 256, %s640_s6, [#allocation4], %s421_s17, %s421_s17, %s422_s18   ;;  %v148_v34 = vadd.f32 %v146_v32, %v144_v31  ;;  %v149_v35 = vmul.f32 0.5, %v147_v33  ;;  %v230_v36 = vpop.eup %229  ;;  %v159_v42 = vld [vmem:[#allocation14] sm:$0xff]  ;;  %v160_v45 = vld [vmem:[#allocation14 + $0x8] sm:$0xff] }
  0x7e   :  { %v232_v38 = vpop.eup %231  ;;  %v152_v39 = vmul.f32 0.6931472, %v230_v36  ;;  %s429_s30 = smov [#allocation14]  }
  0x7f   :  { %v150_v37 = vmul.f32 0.5, %v148_v34  ;;  %v154_v40 = vmul.f32 0.6931472, %v232_v38  ;;  %s195_s22 = sshll.u32 %s429_s30, 4  ;;  %s196_s22 = int_to_ptr.vmem [resolvable:$true] %s195_s22 }
  0x80   :  { %v155_v41 = vsub.f32 %v149_v35, %v152_v39  ;;  %s387_s6 = scalar_lea.vmem %s196_s22, 256  ;;  %p392_p1 = scmp.lt.s32.totalorder %s196_s22, %s196_s22 }
  0x81   :  { %v156_v43 = vsub.f32 %v150_v37, %v154_v40  ;;  %p388_p0 = scmp.ne.s32.totalorder %s196_s22, %s387_s6  ;;  %p393_p2 = scmp.lt.s32.totalorder %s387_s6, %s387_s6 }
  0x82   :  { %v216_v44 = vadd.f32 -0.5, %v155_v41 }
  0x83   :  { %v217_v46 = vadd.f32 -0.5, %v156_v43  ;;  %p394_p3 = por %p393_p2, %p392_p1 }
  0x84   :  { %v161_v47 = vadd.f32 %v216_v44, %v159_v42 }
  0x85   :  { %v162_v48 = vadd.f32 %v217_v46, %v160_v45  ;;  %p395_p4 = pnand %p394_p3, %p388_p0 }
  0x86   :  { %164 = vst.msk [vmem:[#allocation14] sm:$0xff] %vm106_vm2, %v161_v47 }
  0x87   :  { %165 = vst.msk [vmem:[#allocation14 + $0x8] sm:$0xff] %vm106_vm2, %v162_v48 }
  0x88   :  { %398 = shalt.err (!%p395_p4)
}
  0x89   :  { %s399_s25 = scalar_lea.hbm %s642_s8, 256 }
  0x8a   :  { %p400_p5 = scmp.ne.s32.totalorder %s642_s8, %s399_s25  ;;  %p403_p6 = scmp.lt.u32.totalorder %s399_s25, %s642_s8 }
  0x8c   :  { %p405_p7 = pnand %p403_p6, %p400_p5 }
  0x8e   :  { %408 = shalt.err (!%p405_p7)
}
  0x8f   :  { %201 = dma.vmem_to_hbm [thread:$0]  %s196_s22, 256, %s642_s8, [#allocation13], %s421_s17, %s421_s17, %s422_s18  }
  0x90   :  { %415 = dma.done.wait [#allocation4], 256  }
  0x91   :  { %416 = vsyncadd [#allocation4], 4294967040 }
  0x92   :  { %417 = dma.done.wait [#allocation13], 512  }
  0x93   :  { %418 = vsyncadd [#allocation13], 4294966784 }
  0x94   :  { %211 = vsyncpa [#allocation3], 1 }
  0x95   :  { %212 = vsyncpa [#allocation6], 1 }
  0x96   :  { %213 = vsyncpa [#allocation9], 1 }
  0x97   :  { %214 = vsyncpa [#allocation4], 1 }
  0x98   :  { %215 = vsyncpa [#allocation13], 1 }

</bundles_post_ra>
